<compile_context>
chip_gen: v7x
topology: tpu7x:2x2x1
jax: 0.10.0
libtpu: 0.0.40
codegen_flags: <defaults>
</compile_context>

<pallas_src>
import functools
import math

import jax
import jax.numpy as jnp
from jax.experimental import pallas as pl
from jax.experimental.pallas import tpu as pltpu


def _label_smoothing_kernel(logits_ref, target_ref, out_ref, *,
                            padding_idx, confidence, smoothing_value,
                            row_const, prob_mass, batch, block_rows,
                            compute_dtype):
    x = logits_ref[...]                                   # (tb, V)
    if x.dtype != compute_dtype:
        x = x.astype(compute_dtype)
    tb, V = x.shape
    tgt = target_ref[...]                                 # (tb, 1) int32

    # Row validity for the ragged tail tile (logits are NOT padded in HBM).
    row = jax.lax.broadcasted_iota(jnp.int32, (tb, 1), 0)
    valid = (pl.program_id(0) * block_rows + row) < batch  # (tb, 1) bool

    # log-sum-exp over the vocab (lane) axis; accumulate sumexp in f32.
    m = jnp.max(x, axis=-1, keepdims=True)                            # (tb, 1)
    e = jnp.exp(x - m)                                                # (tb, V)
    sumexp = jnp.sum(e, axis=-1, keepdims=True, dtype=jnp.float32)    # (tb, 1)
    lse = m.astype(jnp.float32) + jnp.log(sumexp)                     # (tb, 1)

    # Single weighted lane reduction replaces rowsum / x[tgt] / x[pad]:
    #   w_j = smoothing (j != tgt, pad), 0 (j == pad), confidence (j == tgt)
    # Column iota is (1, V); broadcasting happens inside the compare.
    col = jax.lax.broadcasted_iota(jnp.int32, (1, V), 1)              # (1, V)
    w_base = jnp.where(col == padding_idx,
                       jnp.asarray(0.0, compute_dtype),
                       jnp.asarray(smoothing_value, compute_dtype))   # (1, V)
    w = jnp.where(col == tgt, jnp.asarray(confidence, compute_dtype), w_base)
    wdot = jnp.sum(x * w, axis=-1, keepdims=True, dtype=jnp.float32)  # (tb, 1)

    # Per-row folded KL (all scalar algebra in f32):
    #   loss_row = C + (confidence + smoothing*(V-2)) * lse - sum_j w_j x_j
    row_loss = (jnp.float32(row_const)
                + jnp.float32(prob_mass) * lse
                - wdot)
    keep = valid & (tgt != padding_idx)
    row_loss = jnp.where(keep, row_loss, jnp.float32(0.0))
    partial = jnp.sum(row_loss)                                       # scalar f32

    # Lane-dense per-tile output: just broadcast; wrapper sums [:, 0, 0].
    out_ref[...] = jnp.broadcast_to(partial, out_ref.shape)


def label_smoothing_loss(output, target, *, label_smoothing, tgt_vocab_size,
                         ignore_index, tb=None, force_f32_compute=False):
    """output: (B, V) float logits; target: (B,) int labels. Returns scalar."""
    assert 0.0 < label_smoothing <= 1.0
    B, V = output.shape
    assert V == tgt_vocab_size

    smoothing_value = label_smoothing / (tgt_vocab_size - 2)
    confidence = 1.0 - label_smoothing
    padding_idx = ignore_index % tgt_vocab_size  # mimic negative indexing of one_hot

    # sum_{p>0} p*log(p) for a non-padding row and the total prob mass: Python
    # compile-time constants, so no per-element log() in the kernel.
    row_const = (tgt_vocab_size - 2) * smoothing_value * math.log(smoothing_value)
    if confidence > 0.0:
        row_const += confidence * math.log(confidence)
    prob_mass = confidence + smoothing_value * (tgt_vocab_size - 2)

    itemsize = jnp.dtype(output.dtype).itemsize
    sublane = 8 * max(1, 4 // itemsize)          # 8 rows (f32) / 16 rows (bf16)

    # bf16 inputs compute in bf16 on v6e/v7x (bf16 VPU/EUP), f32 elsewhere.
    if output.dtype == jnp.float32 or force_f32_compute:
        compute_dtype = jnp.float32
    else:
        compute_dtype = output.dtype
        # TODO(synk): bf16 smoothing weights quantize the smoothing term by
        #             ~0.4% relative; switch to force_f32_compute if that matters.

    if tb is None:
        # Working set per grid step (conservative):
        #   2 * tb*V*itemsize   input double-buffer
        #   4 * tb*V*4          in-kernel (tb,V)-sized temporaries (weights,
        #                       exp, products, converts), budgeted at f32.
        # Target 32 MiB so the kernel fits the v7x 64 MiB-per-TC VMEM with
        # headroom (vmem_limit_bytes below is 48 MiB).  At this budget the
        # per-step input DMA is >= ~3-4 MiB, so no extra DMA-granularity
        # rounding is needed.
        budget = 32 * 1024 * 1024
        per_row = 2 * V * itemsize + 4 * V * 4
        rows = max(sublane, (budget // per_row) // sublane * sublane)
        tb = min(int(rows), -(-B // sublane) * sublane)
    assert tb % sublane == 0, (tb, sublane)

    grid = -(-B // tb)
    Bp = grid * tb

    # Only the tiny target vector is padded (with padding_idx) — those rows are
    # gated out both by the row-index predicate and the tgt != padding_idx mask.
    target_i32 = target.astype(jnp.int32)
    if Bp != B:
        target_i32 = jnp.pad(target_i32, (0, Bp - B), constant_values=padding_idx)
    target2d = target_i32.reshape(Bp, 1)

    kernel = functools.partial(
        _label_smoothing_kernel,
        padding_idx=padding_idx,
        confidence=confidence,
        smoothing_value=smoothing_value,
        row_const=row_const,
        prob_mass=prob_mass,
        batch=B,
        block_rows=tb,
        compute_dtype=compute_dtype,
    )

    cost = pl.CostEstimate(
        flops=7 * B * V,
        transcendentals=B * V,
        bytes_accessed=B * V * itemsize + Bp * 4 + grid * 8 * 128 * 4,
    )

    partials = pl.pallas_call(
        kernel,
        out_shape=jax.ShapeDtypeStruct((grid, 8, 128), jnp.float32),
        grid_spec=pltpu.PrefetchScalarGridSpec(
            num_scalar_prefetch=0,
            grid=(grid,),
            in_specs=[
                pl.BlockSpec((tb, V), lambda i: (i, 0)),
                pl.BlockSpec((tb, 1), lambda i: (i, 0)),
            ],
            out_specs=pl.BlockSpec((1, 8, 128), lambda i: (i, 0, 0)),
        ),
        compiler_params=pltpu.CompilerParams(
            dimension_semantics=("parallel",),
            vmem_limit_bytes=48 * 1024 * 1024,
        ),
        cost_estimate=cost,
    )(output, target2d)

    # Final reduction of the (few) per-tile partials in the wrapper.
    return jnp.sum(partials[:, 0, 0])


def _reference(output, target, *, label_smoothing, tgt_vocab_size, ignore_index):
    # Pure-JAX reference reproducing the PyTorch module semantics.
    smoothing_value = label_smoothing / (tgt_vocab_size - 2)
    confidence = 1.0 - label_smoothing
    padding_idx = ignore_index % tgt_vocab_size
    B, V = output.shape
    logp = jax.nn.log_softmax(output.astype(jnp.float32), axis=-1)
    one_hot = jnp.full((V,), smoothing_value, jnp.float32).at[padding_idx].set(0.0)
    model_prob = jnp.tile(one_hot[None, :], (B, 1))
    model_prob = model_prob.at[jnp.arange(B), target].set(confidence)
    model_prob = jnp.where((target == padding_idx)[:, None], 0.0, model_prob)
    safe = jnp.where(model_prob > 0, model_prob, 1.0)
    kl = jnp.where(model_prob > 0, model_prob * (jnp.log(safe) - logp), 0.0)
    return jnp.sum(kl)


if __name__ == "__main__":
    key = jax.random.PRNGKey(0)
    k1, k2 = jax.random.split(key)

    B = 24                 # not a multiple of the explicit tb below -> ragged tail
    V = 128                # tgt_vocab_size
    label_smoothing = 0.1
    ignore_index = 0       # padding index (valid column of the vocab)

    output = jax.random.normal(k1, (B, V), dtype=jnp.float32)
    target = jax.random.randint(k2, (B,), 0, V, dtype=jnp.int32)
    # make sure a couple of rows hit the padding index to exercise the mask
    target = target.at[3].set(ignore_index).at[9].set(ignore_index)

    ref = _reference(output, target,
                     label_smoothing=label_smoothing,
                     tgt_vocab_size=V,
                     ignore_index=ignore_index)

    # 1) auto-sized tile (single block, no ragged tail)
    loss_auto = label_smoothing_loss(
        output, target,
        label_smoothing=label_smoothing,
        tgt_vocab_size=V,
        ignore_index=ignore_index,
    )
    loss_auto = jax.block_until_ready(loss_auto)
    assert jnp.allclose(loss_auto, ref, rtol=1e-4, atol=1e-3), (loss_auto, ref)

    # 2) explicit tb=16 -> grid of 2 with a ragged last tile (rows 24..31 masked
    #    in-kernel; no HBM padding of the logits).
    loss_ragged = label_smoothing_loss(
        output, target,
        label_smoothing=label_smoothing,
        tgt_vocab_size=V,
        ignore_index=ignore_index,
        tb=16,
    )
    loss_ragged = jax.block_until_ready(loss_ragged)
    assert jnp.allclose(loss_ragged, ref, rtol=1e-4, atol=1e-3), (loss_ragged, ref)

    print("KERNEL_OK")
</pallas_src>

<mosaic_0001>
module attributes {stable_mosaic.version = 11 : i64} {
  func.func @_label_smoothing_kernel(%arg0: i32, %arg1: memref<24x128xf32, #tpu.memory_space<vmem>>, %arg2: memref<24x1xi32, #tpu.memory_space<vmem>>, %arg3: memref<1x8x128xf32, #tpu.memory_space<vmem>>) attributes {dimension_semantics = [#tpu.dimension_semantics<parallel>], iteration_bounds = array<i64: 1>, scalar_prefetch = 0 : i64, scratch_operands = 0 : i64, tpu.core_type = #tpu.core_type<tc>, window_params = [{transform_indices = @transform_0, window_bounds = array<i64: 24, 128>}, {transform_indices = @transform_1, window_bounds = array<i64: 24, 1>}, {transform_indices = @transform_2, window_bounds = array<i64: 1, 8, 128>}]} {
    %c0 = arith.constant 0 : index
    %c0_0 = arith.constant 0 : index
    %0 = vector.load %arg1[%c0, %c0_0] : memref<24x128xf32, #tpu.memory_space<vmem>>, vector<24x128xf32>
    %c0_1 = arith.constant 0 : index
    %c0_2 = arith.constant 0 : index
    %1 = vector.load %arg2[%c0_1, %c0_2] : memref<24x1xi32, #tpu.memory_space<vmem>>, vector<24x1xi32>
    %2 = tpu.iota {dimensions = array<i32: 0>} : vector<24x1xi32>
    %c24_i32 = arith.constant 24 : i32
    %3 = arith.muli %arg0, %c24_i32 : i32
    %4 = vector.broadcast %3 : i32 to vector<24x1xi32>
    %5 = arith.addi %4, %2 : vector<24x1xi32>
    %c24_i32_3 = arith.constant 24 : i32
    %6 = vector.broadcast %c24_i32_3 : i32 to vector<24x1xi32>
    %7 = arith.cmpi slt, %5, %6 : vector<24x1xi32>
    %cst = arith.constant dense<0xFF800000> : vector<24xf32>
    %8 = vector.multi_reduction <maximumf>, %0, %cst [1] : vector<24x128xf32> to vector<24xf32>
    %9 = vector.shape_cast %8 : vector<24xf32> to vector<24x1xf32>
    %10 = vector.broadcast %9 : vector<24x1xf32> to vector<24x128xf32>
    %11 = arith.subf %0, %10 : vector<24x128xf32>
    %12 = math.exp %11 : vector<24x128xf32>
    %cst_4 = arith.constant dense<0.000000e+00> : vector<24xf32>
    %13 = vector.multi_reduction <add>, %12, %cst_4 [1] : vector<24x128xf32> to vector<24xf32>
    %14 = vector.shape_cast %13 : vector<24xf32> to vector<24x1xf32>
    %15 = math.log %14 : vector<24x1xf32>
    %16 = arith.addf %9, %15 : vector<24x1xf32>
    %17 = tpu.iota {dimensions = array<i32: 1>} : vector<1x128xi32>
    %c0_i32 = arith.constant 0 : i32
    %18 = vector.broadcast %c0_i32 : i32 to vector<1x128xi32>
    %19 = arith.cmpi eq, %17, %18 : vector<1x128xi32>
    %cst_5 = arith.constant 0.000000e+00 : f32
    %cst_6 = arith.constant 7.93650805E-4 : f32
    %20 = vector.broadcast %cst_5 : f32 to vector<1x128xf32>
    %21 = vector.broadcast %cst_6 : f32 to vector<1x128xf32>
    %22 = arith.select %19, %20, %21 : vector<1x128xi1>, vector<1x128xf32>
    %23 = vector.broadcast %17 : vector<1x128xi32> to vector<24x128xi32>
    %24 = vector.broadcast %1 : vector<24x1xi32> to vector<24x128xi32>
    %25 = arith.cmpi eq, %23, %24 : vector<24x128xi32>
    %cst_7 = arith.constant 0.899999976 : f32
    %26 = vector.broadcast %cst_7 : f32 to vector<24x128xf32>
    %27 = vector.shape_cast %22 : vector<1x128xf32> to vector<1x128xf32>
    %28 = vector.broadcast %27 : vector<1x128xf32> to vector<24x128xf32>
    %29 = arith.select %25, %26, %28 : vector<24x128xi1>, vector<24x128xf32>
    %30 = arith.mulf %0, %29 : vector<24x128xf32>
    %cst_8 = arith.constant dense<0.000000e+00> : vector<24xf32>
    %31 = vector.multi_reduction <add>, %30, %cst_8 [1] : vector<24x128xf32> to vector<24xf32>
    %32 = vector.shape_cast %31 : vector<24xf32> to vector<24x1xf32>
    %cst_9 = arith.constant 1.000000e+00 : f32
    %33 = vector.broadcast %cst_9 : f32 to vector<24x1xf32>
    %34 = arith.mulf %33, %16 : vector<24x1xf32>
    %cst_10 = arith.constant -0.808711171 : f32
    %35 = vector.broadcast %cst_10 : f32 to vector<24x1xf32>
    %36 = arith.addf %35, %34 : vector<24x1xf32>
    %37 = arith.subf %36, %32 : vector<24x1xf32>
    %c0_i32_11 = arith.constant 0 : i32
    %38 = vector.broadcast %c0_i32_11 : i32 to vector<24x1xi32>
    %39 = arith.cmpi ne, %1, %38 : vector<24x1xi32>
    %40 = arith.andi %7, %39 : vector<24x1xi1>
    %cst_12 = arith.constant 0.000000e+00 : f32
    %41 = vector.broadcast %cst_12 : f32 to vector<24x1xf32>
    %42 = arith.select %40, %37, %41 : vector<24x1xi1>, vector<24x1xf32>
    %43 = vector.shape_cast %42 : vector<24x1xf32> to vector<1x24x1xf32>
    %cst_13 = arith.constant dense<0.000000e+00> : vector<1xf32>
    %44 = vector.multi_reduction <add>, %43, %cst_13 [1, 2] : vector<1x24x1xf32> to vector<1xf32>
    %45 = vector.shape_cast %44 : vector<1xf32> to vector<1x1x1xf32>
    %46 = vector.extract %45[0, 0, 0] : f32 from vector<1x1x1xf32>
    %47 = vector.broadcast %46 : f32 to vector<1x8x128xf32>
    %c0_14 = arith.constant 0 : index
    %c0_15 = arith.constant 0 : index
    %c0_16 = arith.constant 0 : index
    %48 = vector.load %arg3[%c0_14, %c0_15, %c0_16] : memref<1x8x128xf32, #tpu.memory_space<vmem>>, vector<1x8x128xf32>
    tpu.vector_store %arg3[%c0_14, %c0_15, %c0_16], %47 {strides = array<i32>} : memref<1x8x128xf32, #tpu.memory_space<vmem>>, vector<1x8x128xf32>,
    return
  }
  func.func @transform_0(%arg0: i32) -> (i32, i32) {
    %c0_i32 = arith.constant 0 : i32
    %c0_i32_0 = arith.constant 0 : i32
    return %arg0, %c0_i32 : i32, i32
  }
  func.func @transform_1(%arg0: i32) -> (i32, i32) {
    %c0_i32 = arith.constant 0 : i32
    %c0_i32_0 = arith.constant 0 : i32
    return %arg0, %c0_i32 : i32, i32
  }
  func.func @transform_2(%arg0: i32) -> (i32, i32, i32) {
    %c0_i32 = arith.constant 0 : i32
    %c0_i32_0 = arith.constant 0 : i32
    %c0_i32_1 = arith.constant 0 : i32
    return %arg0, %c0_i32, %c0_i32_0 : i32, i32, i32
  }
}

</mosaic_0001>

<bundles_post_ra>
// kernel: tpu_custom_call.1
= control target key start
LH: loop header
LB: loop body
LE: loop exit
PB: predicated region body
PF: predicated region fallthrough
CT: control target
= control target key end

     0   :  { %v177_v3 = vmov 0   ;;  %s237_s0 = inlined_call_operand.vmem [shape: f32[24,128], index: 0, kind: input, shape index: {}]   ;;  %s238_s1 = inlined_call_operand.vmem [shape: s32[24,1], index: 1, kind: input, shape index: {}]   ;;  %s239_s2 = inlined_call_operand.hbm [shape: f32[1,8,128], index: 2, kind: output, shape index: {}]  }
   0x1   :  { %v12_v0 = vld [vmem:[%s237_s0] sm:$0xff]  ;;  %v14_v1 = vld [vmem:[%s237_s0 + $0x10] sm:$0xff]  ;;  %v13_v2 = vld [vmem:[%s237_s0 + $0x8] sm:$0xff]  ;;  %139 = vset.pattern.permute.xlu1 %v177_v3  ;;  %140 = vset.pattern.permute.xlu0 %v177_v3 }
   0x2   :  { %30 = vmax.xlane.f32.xlu0 %v12_v0  ;;  %34 = vmax.xlane.f32.xlu1 %v14_v1 }
   0x3   :  { %7 = vsyncpa [#allocation3], 0  ;;  %v207_v4 = vld [vmem:[%s238_s1] sm:$0xff]  ;;  %v213_v5 = vld [vmem:[%s238_s1 + $0x10] sm:$0xff]  ;;  %v60_v13 = vlaneseq  ;;  %v178_v19 = vmov 0.0007936508  }
   0x4   :  { %v219_v6 = vld [vmem:[%s238_s1 + $0x8] sm:$0xff]  ;;  %vm94_vm4 = vcmp.ne.s32.totalorder %v207_v4, 0  ;;  %vm96_vm6 = vcmp.ne.s32.totalorder %v213_v5, 0  ;;  %vm103_vm7 = vcmask 7168   ;;  %s179_s1 = smov [#allocation2]  }
   0x5   :  { %v61_v17 = vand.u32 127, %v60_v13  ;;  %vm95_vm5 = vcmp.ne.s32.totalorder %v219_v6, 0  ;;  %s126_s20 = sshll.u32 %s179_s1, 4  ;;  %s127_s20 = int_to_ptr.vmem [resolvable:$true] %s126_s20 }
   0x6   :  { %32 = vmax.xlane.f32.xlu0 %v13_v2  ;;  %s153_s22 = scalar_lea.vmem %s127_s20, 128  ;;  %p158_p1 = scmp.lt.s32.totalorder %s127_s20, %s127_s20 }
   0x7   :  { %vm62_vm0 = vcmp.eq.s32.totalorder %v61_v17, 0  ;;  %p154_p0 = scmp.ne.s32.totalorder %s127_s20, %s153_s22  ;;  %p159_p2 = scmp.lt.s32.totalorder %s153_s22, %s153_s22 }
   0x8   :  { %v63_v20 = vsel %vm62_vm0, 0.0, %v178_v19 }
   0x9   :  { %p160_p3 = por %p159_p2, %p158_p1 }
   0xb   :  { %p161_p4 = pnand %p160_p3, %p154_p0 }
  0x13   :  { %65 = vperm.xlu1 %139, %v207_v4  }
  0x17   :  { %71 = vperm.xlu1 %139, %v213_v5  }
  0x1c   :  { %68 = vperm.xlu0 %140, %v219_v6  }
  0x8f   :  { %v31_v7 = vpop.xlane.xlu0 %30  ;;  %v35_v8 = vpop.xlane.xlu1 %34 }
  0x90   :  { %v36_v9 = vsub.f32 %v12_v0, %v31_v7  ;;  %v38_v10 = vsub.f32 %v14_v1, %v35_v8 }
  0x92   :  { %v39_v11 = vmul.f32 1.442695, %v36_v9  ;;  %v43_v12 = vmul.f32 1.442695, %v38_v10 }
  0x93   :  { %v33_v14 = vpop.xlane.xlu0 %32  ;;  %v66_v18 = vpop.permute.xlu1 %65 }
  0x94   :  { %141 = vpow2.f32 %v39_v11  ;;  %v37_v15 = vsub.f32 %v13_v2, %v33_v14  ;;  %vm73_vm1 = vcmp.eq.s32.totalorder %v61_v17, %v66_v18 }
  0x95   :  { %143 = vpow2.f32 %v43_v12  ;;  %v76_v24 = vsel %vm73_vm1, 0.9, %v63_v20 }
  0x96   :  { %v41_v16 = vmul.f32 1.442695, %v37_v15  ;;  %v79_v27 = vmul.f32 %v76_v24, %v12_v0 }
  0x97   :  { %v72_v26 = vpop.permute.xlu1 %71 }
  0x98   :  { %145 = vpow2.f32 %v41_v16  ;;  %vm75_vm3 = vcmp.eq.s32.totalorder %v61_v17, %v72_v26 }
  0x99   :  { %v78_v30 = vsel %vm75_vm3, 0.9, %v63_v20 }
  0x9a   :  { %v81_v31 = vmul.f32 %v78_v30, %v14_v1 }
  0x9b   :  { %v69_v22 = vpop.permute.xlu0 %68 }
  0x9c   :  { %vm74_vm2 = vcmp.eq.s32.totalorder %v61_v17, %v69_v22 }
  0x9d   :  { %v77_v28 = vsel %vm74_vm2, 0.9, %v63_v20 }
  0x9e   :  { %v142_v21 = vpop.eup %141  ;;  %v80_v29 = vmul.f32 %v77_v28, %v13_v2 }
  0x9f   :  { %45 = vadd.xlane.f32.xlu1 %v142_v21  ;;  %v144_v23 = vpop.eup %143 }
  0xa2   :  { %v146_v25 = vpop.eup %145 }
  0xa3   :  { %49 = vadd.xlane.f32.xlu1 %v144_v23  ;;  %47 = vadd.xlane.f32.xlu0 %v146_v25 }
  0xa7   :  { %82 = vadd.xlane.f32.xlu1 %v79_v27 }
  0xab   :  { %84 = vadd.xlane.f32.xlu1 %v80_v29 }
  0xaf   :  { %86 = vadd.xlane.f32.xlu1 %v81_v31 }
 0x12c   :  { %v46_v32 = vpop.xlane.xlu1 %45 }
 0x12d   :  { %147 = vlog2.f32 %v46_v32 }
 0x130   :  { %v50_v33 = vpop.xlane.xlu1 %49  ;;  %v48_v34 = vpop.xlane.xlu0 %47 }
 0x131   :  { %149 = vlog2.f32 %v50_v33 }
 0x132   :  { %151 = vlog2.f32 %v48_v34 }
 0x134   :  { %v83_v35 = vpop.xlane.xlu1 %82 }
 0x137   :  { %v148_v36 = vpop.eup %147 }
 0x138   :  { %v52_v37 = vmul.f32 0.6931472, %v148_v36  ;;  %v85_v40 = vpop.xlane.xlu1 %84 }
 0x13a   :  { %v57_v38 = vadd.f32 %v52_v37, %v31_v7 }
 0x13b   :  { %v150_v39 = vpop.eup %149 }
 0x13c   :  { %v152_v41 = vpop.eup %151  ;;  %v56_v42 = vmul.f32 0.6931472, %v150_v39  ;;  %v88_v43 = vadd.f32 -0.8087112, %v57_v38  ;;  %v87_v50 = vpop.xlane.xlu1 %86 }
 0x13d   :  { %v54_v44 = vmul.f32 0.6931472, %v152_v41 }
 0x13e   :  { %v59_v45 = vadd.f32 %v56_v42, %v35_v8  ;;  %v91_v46 = vsub.f32 %v88_v43, %v83_v35 }
 0x13f   :  { %v58_v47 = vadd.f32 %v54_v44, %v33_v14 }
 0x140   :  { %v90_v48 = vadd.f32 -0.8087112, %v59_v45  ;;  %v100_v52 = vsel %vm94_vm4, %v91_v46, 0.0 }
 0x141   :  { %v89_v49 = vadd.f32 -0.8087112, %v58_v47  ;;  %v104_v56 = vsel %vm103_vm7, %v100_v52, 0.0 }
 0x142   :  { %v93_v51 = vsub.f32 %v90_v48, %v87_v50 }
 0x143   :  { %v92_v53 = vsub.f32 %v89_v49, %v85_v40 }
 0x144   :  { %v102_v55 = vsel %vm96_vm6, %v93_v51, 0.0 }
 0x145   :  { %v101_v54 = vsel %vm95_vm5, %v92_v53, 0.0  ;;  %v107_v59 = vsel %vm103_vm7, %v102_v55, 0.0 }
 0x146   :  { %v105_v57 = vsel %vm103_vm7, %v101_v54, 0.0 }
 0x147   :  { %v106_v58 = vadd.f32 %v105_v57, %v104_v56 }
 0x149   :  { %v108_v60 = vadd.f32 %v107_v59, %v106_v58 }
 0x14b   :  { %109 = vadd.xlane.f32.xlu1 %v108_v60 }
 0x1d8   :  { %v110_v61 = vpop.xlane.xlu1 %109 }
 0x1d9   :  { %v111_v62 = vrot.slane %v110_v61, 4 }
 0x1db   :  { %v112_v63 = vadd.f32 %v111_v62, %v110_v61 }
 0x1dd   :  { %v113_v0 = vrot.slane %v112_v63, 2 }
 0x1df   :  { %v114_v1 = vadd.f32 %v113_v0, %v112_v63 }
 0x1e1   :  { %v115_v2 = vrot.slane %v114_v1, 1 }
 0x1e3   :  { %v116_v3 = vadd.f32 %v115_v2, %v114_v1 }
 0x1e5   :  { %134 = vpush %v116_v3 }
 0x216   :  { %s135_s21 = spop %134 }
 0x217   :  { %v118_v4 = vstv %s135_s21 }
 0x218   :  { %119 = vst [vmem:[#allocation2] sm:$0xff] %v118_v4 }
 0x219   :  { %164 = shalt.err (!%p161_p4)
}
 0x21a   :  { %s165_s25 = scalar_lea.hbm %s239_s2, 128 }
 0x21b   :  { %p166_p5 = scmp.ne.s32.totalorder %s239_s2, %s165_s25  ;;  %p169_p6 = scmp.lt.u32.totalorder %s165_s25, %s239_s2 }
 0x21d   :  { %p171_p7 = pnand %p169_p6, %p166_p5 }
 0x21f   :  { %174 = shalt.err (!%p171_p7)
}
 0x220   :  { %129 = dma.vmem_to_hbm [thread:$0]  %s127_s20, 128, %s239_s2, [#allocation3]  }
 0x221   :  { %175 = dma.done.wait [#allocation3], 128  }
 0x222   :  { %176 = vsyncadd [#allocation3], 4294967168 }
 0x223   :  { %133 = vsyncpa [#allocation3], 1 }

</bundles_post_ra>
